<compile_context>
chip_gen: v6e
topology: v6e:2x2x1
jax: 0.10.0
libtpu: 0.0.40
codegen_flags: <defaults>
</compile_context>

<pallas_src>
import functools

import jax
import jax.numpy as jnp
from jax.experimental import pallas as pl
from jax.experimental.pallas import tpu as pltpu

LANE = 128          # padded feature width of the hidden layers (lane-dense tiles)
_NEG_SLOPE = 0.01   # PyTorch nn.LeakyReLU default


def _round_up(n, m):
    return ((n + m - 1) // m) * m


def dqn_kernel(x_ref, w_ref, b_ref, q_ref, *, output_size):
    """x_ref: (TB, IN_W) fp32, w_ref: (4P, P) fp32/bf16, b_ref: (8, P) fp32,
    q_ref: (TB, output_size) fp32."""
    P = w_ref.shape[1]
    in_w = x_ref.shape[1]
    cdt = w_ref.dtype                      # MXU input dtype (fp32 or bf16)
    b = b_ref[...]                         # (8, P) fp32; rows 0..3 used

    def linear(act_cdt, layer, k):
        # static, sublane-aligned slice of the packed weight slab
        w = w_ref[layer * P:layer * P + k, :]
        acc = jnp.dot(act_cdt, w, preferred_element_type=jnp.float32)
        return acc + b[layer:layer + 1, :]                 # fp32 bias add

    def act(z_f32):
        # LeakyReLU in fp32, then one cast to the MXU input dtype.
        return jnp.where(z_f32 > 0, z_f32, _NEG_SLOPE * z_f32).astype(cdt)

    x0 = x_ref[...].astype(cdt)            # single input cast
    h     = act(linear(x0, 0, in_w))       # feature Linear 1 + LeakyReLU
    feats = act(linear(h, 1, P))           # feature Linear 2 + LeakyReLU
    hd    = act(linear(feats, 2, P))       # fused [value-hidden | adv-hidden | 0...]
    head  = linear(hd, 3, P)               # fp32: lanes 0..out-1 = A, lane out = V, rest 0

    v = head[:, output_size:output_size + 1]               # (TB, 1)
    # Padded lanes of `head` are exactly zero (zero weights + zero bias), so
    # row-sum minus V equals sum(advantages).  1/output_size is a constant.
    adv_mean = (jnp.sum(head, axis=1, keepdims=True) - v) * (1.0 / output_size)
    # Q = V + (A - mean(A)); only lanes 0..output_size-1 are written back.
    q_ref[...] = head[:, 0:q_ref.shape[1]] + (v - adv_mean)


def pack_params(p, *, input_size, hidden_size, output_size,
                weight_dtype=jnp.bfloat16):
    """Pack all weights/biases into one weight slab and one bias slab.

    Weight slab layout (4 vertically stacked PxP blocks, P = 128):
      block 0: w1  (input_size, H)        at cols 0:H
      block 1: w2  (H, H)                 at cols 0:H
      block 2: [wv1 | wa1]  (H, 2H)       wv1 -> cols 0:H, wa1 -> cols H:2H
      block 3: fused head                 wa2 -> rows H:2H, cols 0:out
                                          wv2 -> rows 0:H,  col  out
    Bias slab (8, P) fp32: rows 0..3 hold the matching padded bias rows.
    """
    P, H = LANE, hidden_size
    assert input_size <= P and 2 * H <= P and output_size + 1 <= P

    w_all = jnp.zeros((4 * P, P), jnp.float32)
    b_all = jnp.zeros((8, P), jnp.float32)

    # layer 0: feature Linear(input_size -> H)
    w_all = w_all.at[0:input_size, 0:H].set(p["w1"])
    b_all = b_all.at[0, 0:H].set(p["b1"][0])
    # layer 1: feature Linear(H -> H)
    w_all = w_all.at[P:P + H, 0:H].set(p["w2"])
    b_all = b_all.at[1, 0:H].set(p["b2"][0])
    # layer 2: fused value/adv hidden Linear(H -> 2H)
    w_all = w_all.at[2 * P:2 * P + H, 0:H].set(p["wv1"])
    w_all = w_all.at[2 * P:2 * P + H, H:2 * H].set(p["wa1"])
    b_all = b_all.at[2, 0:H].set(p["bv1"][0])
    b_all = b_all.at[2, H:2 * H].set(p["ba1"][0])
    # layer 3: fused head Linear(2H -> out + 1); A in lanes 0:out, V in lane out
    w_all = w_all.at[3 * P + H:3 * P + 2 * H, 0:output_size].set(p["wa2"])
    w_all = w_all.at[3 * P:3 * P + H, output_size:output_size + 1].set(p["wv2"])
    b_all = b_all.at[3, 0:output_size].set(p["ba2"][0])
    b_all = b_all.at[3, output_size:output_size + 1].set(p["bv2"][0])

    return w_all.astype(weight_dtype), b_all


def dqn_forward(x, packed, output_size, *, batch_tile=1024):
    """x: (B, input_size) fp32. packed: (w_all, b_all) from pack_params."""
    w_all, b_all = packed
    B, in_features = x.shape
    P = w_all.shape[1]

    IN_W = _round_up(in_features, 8)       # aligned slice of weight block 0
    B8 = _round_up(B, 8)
    TB = min(_round_up(batch_tile, 8), B8)
    Bp = _round_up(B8, TB)

    # Only pad when strictly needed (rows to Bp, feature lanes to IN_W).
    if (Bp, IN_W) == (B, in_features):
        x_in = x
    else:
        x_in = jnp.zeros((Bp, IN_W), x.dtype).at[:B, :in_features].set(x)

    # Scoped-VMEM estimate: double-buffered I/O tiles + weight/bias slabs +
    # fp32 intermediates.  Explicit limit keeps large tiles compiling on v5e
    # (16 MiB scoped default) without exceeding v7x headroom.
    wb = jnp.dtype(w_all.dtype).itemsize
    est = (2 * (TB * IN_W * 4 + TB * output_size * 4)
           + 2 * (4 * P * P * wb + 8 * P * 4)
           + 8 * TB * P * 4)
    vmem_limit = int(min(max(est, 16 * 2 ** 20), 56 * 2 ** 20))

    kernel = functools.partial(dqn_kernel, output_size=output_size)

    out = pl.pallas_call(
        kernel,
        out_shape=jax.ShapeDtypeStruct((Bp, output_size), jnp.float32),
        grid_spec=pltpu.PrefetchScalarGridSpec(
            num_scalar_prefetch=0,
            grid=(Bp // TB,),
            in_specs=[
                pl.BlockSpec((TB, IN_W), lambda i: (i, 0)),      # batch-tiled x
                pl.BlockSpec((4 * P, P), lambda i: (0, 0)),      # weights, VMEM-resident
                pl.BlockSpec((8, P), lambda i: (0, 0)),          # biases, VMEM-resident
            ],
            out_specs=pl.BlockSpec((TB, output_size), lambda i: (i, 0)),
        ),
        compiler_params=pltpu.CompilerParams(
            dimension_semantics=("parallel",),    # shards batch tiles on v7x's 2 TCs
            vmem_limit_bytes=vmem_limit),
    )(x_in, w_all, b_all)

    return out if Bp == B else out[:B]


def init_params(key, input_size, hidden_size, output_size):
    """PyTorch-style Linear init: U(-1/sqrt(fan_in), 1/sqrt(fan_in)).

    Weights stored (in_features, out_features); biases (1, out_features).
    (Real torch nn.Linear weights are (out, in) — transpose before packing.)
    """
    def linear(key, fan_in, fan_out):
        kw, kb = jax.random.split(key)
        bound = 1.0 / jnp.sqrt(fan_in)
        w = jax.random.uniform(kw, (fan_in, fan_out), jnp.float32, -bound, bound)
        b = jax.random.uniform(kb, (1, fan_out), jnp.float32, -bound, bound)
        return w, b

    keys = jax.random.split(key, 6)
    w1, b1 = linear(keys[0], input_size, hidden_size)
    w2, b2 = linear(keys[1], hidden_size, hidden_size)
    wv1, bv1 = linear(keys[2], hidden_size, hidden_size)
    wv2, bv2 = linear(keys[3], hidden_size, 1)
    wa1, ba1 = linear(keys[4], hidden_size, hidden_size)
    wa2, ba2 = linear(keys[5], hidden_size, output_size)
    return dict(w1=w1, b1=b1, w2=w2, b2=b2,
                wv1=wv1, bv1=bv1, wv2=wv2, bv2=bv2,
                wa1=wa1, ba1=ba1, wa2=wa2, ba2=ba2)


def dqn_reference(x, p):
    """Pure-JAX reference mirroring the PyTorch module."""
    lrelu = lambda z: jnp.where(z > 0, z, 0.01 * z)
    h = lrelu(x @ p["w1"] + p["b1"])
    feats = lrelu(h @ p["w2"] + p["b2"])
    values = lrelu(feats @ p["wv1"] + p["bv1"]) @ p["wv2"] + p["bv2"]
    adv = lrelu(feats @ p["wa1"] + p["ba1"]) @ p["wa2"] + p["ba2"]
    return values + (adv - adv.mean(axis=1, keepdims=True))


if __name__ == "__main__":
    input_size, hidden_size, output_size = 16, 32, 4
    key = jax.random.PRNGKey(0)
    k_params, k_x1, k_x2 = jax.random.split(key, 3)
    params = init_params(k_params, input_size, hidden_size, output_size)

    # --- small batch, fp32 weights: tight-match check ------------------------
    x_small = jax.random.normal(k_x1, (8, input_size), dtype=jnp.float32)
    packed_f32 = pack_params(params, input_size=input_size,
                             hidden_size=hidden_size, output_size=output_size,
                             weight_dtype=jnp.float32)
    q = jax.block_until_ready(dqn_forward(x_small, packed_f32, output_size))
    q_ref = dqn_reference(x_small, params)
    assert q.shape == (8, output_size)
    assert jnp.allclose(q, q_ref, atol=1e-4, rtol=1e-4), "fp32 mismatch vs reference"

    # --- larger ragged batch: exercises batch grid + row padding -------------
    x_big = jax.random.normal(k_x2, (300, input_size), dtype=jnp.float32)
    q_big = jax.block_until_ready(
        dqn_forward(x_big, packed_f32, output_size, batch_tile=128))
    q_big_ref = dqn_reference(x_big, params)
    assert q_big.shape == (300, output_size)
    assert jnp.allclose(q_big, q_big_ref, atol=1e-4, rtol=1e-4), "gridded mismatch"

    # --- bf16 weights (default; v6e/v7x MXU path): loose check ---------------
    packed_bf16 = pack_params(params, input_size=input_size,
                              hidden_size=hidden_size, output_size=output_size)
    q_bf16 = jax.block_until_ready(dqn_forward(x_small, packed_bf16, output_size))
    assert jnp.allclose(q_bf16, q_ref, atol=1e-1, rtol=1e-1), "bf16 path diverged"

    print("KERNEL_OK")
</pallas_src>

<mosaic_0001>
module attributes {stable_mosaic.version = 11 : i64} {
  func.func @dqn_kernel(%arg0: i32, %arg1: memref<8x16xf32, #tpu.memory_space<vmem>>, %arg2: memref<512x128xf32, #tpu.memory_space<vmem>>, %arg3: memref<8x128xf32, #tpu.memory_space<vmem>>, %arg4: memref<8x4xf32, #tpu.memory_space<vmem>>) attributes {dimension_semantics = [#tpu.dimension_semantics<parallel>], iteration_bounds = array<i64: 1>, scalar_prefetch = 0 : i64, scratch_operands = 0 : i64, tpu.core_type = #tpu.core_type<tc>, window_params = [{transform_indices = @transform_0, window_bounds = array<i64: 8, 16>}, {pipeline_mode = #tpu.pipeline_mode<synchronous>, transform_indices = @transform_1, window_bounds = array<i64: 512, 128>}, {pipeline_mode = #tpu.pipeline_mode<synchronous>, transform_indices = @transform_2, window_bounds = array<i64: 8, 128>}, {transform_indices = @transform_3, window_bounds = array<i64: 8, 4>}]} {
    %c0 = arith.constant 0 : index
    %c0_0 = arith.constant 0 : index
    %0 = vector.load %arg3[%c0, %c0_0] : memref<8x128xf32, #tpu.memory_space<vmem>>, vector<8x128xf32>
    %c0_1 = arith.constant 0 : index
    %c0_2 = arith.constant 0 : index
    %1 = vector.load %arg1[%c0_1, %c0_2] : memref<8x16xf32, #tpu.memory_space<vmem>>, vector<8x16xf32>
    %c0_3 = arith.constant 0 : index
    %c0_4 = arith.constant 0 : index
    %2 = vector.load %arg2[%c0_3, %c0_4] : memref<512x128xf32, #tpu.memory_space<vmem>>, vector<16x128xf32>
    %cst = arith.constant dense<0.000000e+00> : vector<8x128xf32>
    %3 = tpu.matmul %1, %2, %cst {dimension_numbers = #tpu.dot_dimension_numbers<[1], [0], [0], [1], [0, 0, 1, 1], [], []>} : vector<8x16xf32>, vector<16x128xf32>, vector<8x128xf32> -> vector<8x128xf32>
    %4 = vector.extract_strided_slice %0 {offsets = [0, 0], sizes = [1, 128], strides = [1, 1]} : vector<8x128xf32> to vector<1x128xf32>
    %5 = vector.broadcast %4 : vector<1x128xf32> to vector<8x128xf32>
    %6 = arith.addf %3, %5 : vector<8x128xf32>
    %cst_5 = arith.constant 0.000000e+00 : f32
    %7 = vector.broadcast %cst_5 : f32 to vector<8x128xf32>
    %8 = arith.cmpf ogt, %6, %7 : vector<8x128xf32>
    %cst_6 = arith.constant 0.00999999977 : f32
    %9 = vector.broadcast %cst_6 : f32 to vector<8x128xf32>
    %10 = arith.mulf %9, %6 : vector<8x128xf32>
    %11 = arith.select %8, %6, %10 : vector<8x128xi1>, vector<8x128xf32>
    %c128 = arith.constant 128 : index
    %c0_7 = arith.constant 0 : index
    %12 = vector.load %arg2[%c128, %c0_7] : memref<512x128xf32, #tpu.memory_space<vmem>>, vector<128x128xf32>
    %cst_8 = arith.constant dense<0.000000e+00> : vector<8x128xf32>
    %13 = tpu.matmul %11, %12, %cst_8 {dimension_numbers = #tpu.dot_dimension_numbers<[1], [0], [0], [1], [0, 0, 1, 1], [], []>} : vector<8x128xf32>, vector<128x128xf32>, vector<8x128xf32> -> vector<8x128xf32>
    %14 = vector.extract_strided_slice %0 {offsets = [1, 0], sizes = [1, 128], strides = [1, 1]} : vector<8x128xf32> to vector<1x128xf32>
    %15 = vector.broadcast %14 : vector<1x128xf32> to vector<8x128xf32>
    %16 = arith.addf %13, %15 : vector<8x128xf32>
    %cst_9 = arith.constant 0.000000e+00 : f32
    %17 = vector.broadcast %cst_9 : f32 to vector<8x128xf32>
    %18 = arith.cmpf ogt, %16, %17 : vector<8x128xf32>
    %cst_10 = arith.constant 0.00999999977 : f32
    %19 = vector.broadcast %cst_10 : f32 to vector<8x128xf32>
    %20 = arith.mulf %19, %16 : vector<8x128xf32>
    %21 = arith.select %18, %16, %20 : vector<8x128xi1>, vector<8x128xf32>
    %c256 = arith.constant 256 : index
    %c0_11 = arith.constant 0 : index
    %22 = vector.load %arg2[%c256, %c0_11] : memref<512x128xf32, #tpu.memory_space<vmem>>, vector<128x128xf32>
    %cst_12 = arith.constant dense<0.000000e+00> : vector<8x128xf32>
    %23 = tpu.matmul %21, %22, %cst_12 {dimension_numbers = #tpu.dot_dimension_numbers<[1], [0], [0], [1], [0, 0, 1, 1], [], []>} : vector<8x128xf32>, vector<128x128xf32>, vector<8x128xf32> -> vector<8x128xf32>
    %24 = vector.extract_strided_slice %0 {offsets = [2, 0], sizes = [1, 128], strides = [1, 1]} : vector<8x128xf32> to vector<1x128xf32>
    %25 = vector.broadcast %24 : vector<1x128xf32> to vector<8x128xf32>
    %26 = arith.addf %23, %25 : vector<8x128xf32>
    %cst_13 = arith.constant 0.000000e+00 : f32
    %27 = vector.broadcast %cst_13 : f32 to vector<8x128xf32>
    %28 = arith.cmpf ogt, %26, %27 : vector<8x128xf32>
    %cst_14 = arith.constant 0.00999999977 : f32
    %29 = vector.broadcast %cst_14 : f32 to vector<8x128xf32>
    %30 = arith.mulf %29, %26 : vector<8x128xf32>
    %31 = arith.select %28, %26, %30 : vector<8x128xi1>, vector<8x128xf32>
    %c384 = arith.constant 384 : index
    %c0_15 = arith.constant 0 : index
    %32 = vector.load %arg2[%c384, %c0_15] : memref<512x128xf32, #tpu.memory_space<vmem>>, vector<128x128xf32>
    %cst_16 = arith.constant dense<0.000000e+00> : vector<8x128xf32>
    %33 = tpu.matmul %31, %32, %cst_16 {dimension_numbers = #tpu.dot_dimension_numbers<[1], [0], [0], [1], [0, 0, 1, 1], [], []>} : vector<8x128xf32>, vector<128x128xf32>, vector<8x128xf32> -> vector<8x128xf32>
    %34 = vector.extract_strided_slice %0 {offsets = [3, 0], sizes = [1, 128], strides = [1, 1]} : vector<8x128xf32> to vector<1x128xf32>
    %35 = vector.broadcast %34 : vector<1x128xf32> to vector<8x128xf32>
    %36 = arith.addf %33, %35 : vector<8x128xf32>
    %37 = vector.extract_strided_slice %36 {offsets = [0, 4], sizes = [8, 1], strides = [1, 1]} : vector<8x128xf32> to vector<8x1xf32>
    %cst_17 = arith.constant dense<0.000000e+00> : vector<8xf32>
    %38 = vector.multi_reduction <add>, %36, %cst_17 [1] : vector<8x128xf32> to vector<8xf32>
    %39 = vector.shape_cast %38 : vector<8xf32> to vector<8x1xf32>
    %40 = arith.subf %39, %37 : vector<8x1xf32>
    %cst_18 = arith.constant 2.500000e-01 : f32
    %41 = vector.broadcast %cst_18 : f32 to vector<8x1xf32>
    %42 = arith.mulf %40, %41 : vector<8x1xf32>
    %43 = vector.extract_strided_slice %36 {offsets = [0, 0], sizes = [8, 4], strides = [1, 1]} : vector<8x128xf32> to vector<8x4xf32>
    %44 = arith.subf %37, %42 : vector<8x1xf32>
    %45 = vector.broadcast %44 : vector<8x1xf32> to vector<8x4xf32>
    %46 = arith.addf %43, %45 : vector<8x4xf32>
    %c0_19 = arith.constant 0 : index
    %c0_20 = arith.constant 0 : index
    %47 = vector.load %arg4[%c0_19, %c0_20] : memref<8x4xf32, #tpu.memory_space<vmem>>, vector<8x4xf32>
    tpu.vector_store %arg4[%c0_19, %c0_20], %46 {strides = array<i32>} : memref<8x4xf32, #tpu.memory_space<vmem>>, vector<8x4xf32>,
    return
  }
  func.func @transform_0(%arg0: i32) -> (i32, i32) {
    %c0_i32 = arith.constant 0 : i32
    %c0_i32_0 = arith.constant 0 : i32
    return %arg0, %c0_i32 : i32, i32
  }
  func.func @transform_1(%arg0: i32) -> (i32, i32) {
    %c0_i32 = arith.constant 0 : i32
    %c0_i32_0 = arith.constant 0 : i32
    %c0_i32_1 = arith.constant 0 : i32
    return %c0_i32, %c0_i32_0 : i32, i32
  }
  func.func @transform_2(%arg0: i32) -> (i32, i32) {
    %c0_i32 = arith.constant 0 : i32
    %c0_i32_0 = arith.constant 0 : i32
    %c0_i32_1 = arith.constant 0 : i32
    return %c0_i32, %c0_i32_0 : i32, i32
  }
  func.func @transform_3(%arg0: i32) -> (i32, i32) {
    %c0_i32 = arith.constant 0 : i32
    %c0_i32_0 = arith.constant 0 : i32
    return %arg0, %c0_i32 : i32, i32
  }
}

</mosaic_0001>

<bundles_post_ra>
// kernel: tpu_custom_call.1
= control target key start
LH: loop header
LB: loop body
LE: loop exit
PB: predicated region body
PF: predicated region fallthrough
CT: control target
= control target key end

     0   :  { %8 = vsyncpa [#allocation3], 0  ;;  %s781_s0 = inlined_call_operand.hbm [shape: f32[8,16], index: 0, kind: input, shape index: {}]   ;;  %s782_s1 = inlined_call_operand.hbm [shape: f32[512,128], index: 1, kind: input, shape index: {}]   ;;  %s783_s2 = inlined_call_operand.hbm [shape: f32[8,128], index: 2, kind: input, shape index: {}]   ;;  %s784_s3 = inlined_call_operand.vmem [shape: f32[8,4], index: 3, kind: output, shape index: {}]  }
   0x1   :  { %9 = vsyncpa [#allocation5], 0  ;;  %s671_s12 = smov [#allocation4]  }
   0x2   :  { %s25_s13 = sshll.u32 %s671_s12, 4  ;;  %s26_s13 = int_to_ptr.vmem [resolvable:$true] %s25_s13 }
   0x3   :  { %s615_s14 = scalar_lea.vmem %s26_s13, 8192  ;;  %p620_p1 = scmp.lt.s32.totalorder %s26_s13, %s26_s13 }
   0x4   :  { %p616_p0 = scmp.ne.s32.totalorder %s26_s13, %s615_s14  ;;  %p621_p2 = scmp.lt.s32.totalorder %s615_s14, %s615_s14 }
   0x6   :  { %p622_p3 = por %p621_p2, %p620_p1 }
   0x8   :  { %p623_p4 = pnand %p622_p3, %p616_p0 }
   0xa   :  { %626 = shalt.err (!%p623_p4)
}
   0xb   :  { %s672_s15 = smov 128   ;;  %s673_s16 = smov 8  }
   0xc   :  { %31 = dma.hbm_to_vmem [thread:$0]  %s782_s1, 8192, %s26_s13, [#allocation5], %s672_s15, %s672_s15, %s673_s16  }
   0xd   :  { %s674_s19 = smov [#allocation2]   ;;  %s675_s21 = smov [#allocation6]  }
   0xe   :  { %s16_s20 = sshll.u32 %s674_s19, 4  ;;  %s38_s22 = sshll.u32 %s675_s21, 4  ;;  %s17_s20 = int_to_ptr.vmem [resolvable:$true] %s16_s20  ;;  %s39_s22 = int_to_ptr.vmem [resolvable:$true] %s38_s22 }
   0xf   :  { %s635_s23 = scalar_lea.vmem %s17_s20, 128  ;;  %p640_p6 = scmp.lt.s32.totalorder %s17_s20, %s17_s20 }
  0x10   :  { %p636_p5 = scmp.ne.s32.totalorder %s17_s20, %s635_s23  ;;  %p641_p7 = scmp.lt.s32.totalorder %s635_s23, %s635_s23 }
  0x12   :  { %p642_p8 = por %p641_p7, %p640_p6 }
  0x14   :  { %p643_p9 = pnand %p642_p8, %p636_p5 }
  0x16   :  { %646 = shalt.err (!%p643_p9)
}
  0x17   :  { %19 = dma.hbm_to_vmem [thread:$0]  %s781_s0, 128, %s17_s20, [#allocation3]  }
  0x18   :  { %s655_s26 = scalar_lea.vmem %s39_s22, 128  ;;  %p660_p11 = scmp.lt.s32.totalorder %s39_s22, %s39_s22 }
  0x19   :  { %p656_p10 = scmp.ne.s32.totalorder %s39_s22, %s655_s26  ;;  %p661_p12 = scmp.lt.s32.totalorder %s655_s26, %s655_s26 }
  0x1b   :  { %p662_p13 = por %p661_p12, %p660_p11 }
  0x1d   :  { %p663_p0 = pnand %p662_p13, %p656_p10 }
  0x1f   :  { %666 = shalt.err (!%p663_p0)
}
  0x20   :  { %41 = dma.hbm_to_vmem [thread:$0]  %s783_s2, 128, %s39_s22, [#allocation5]  }
  0x21   :  { %667 = dma.done.wait [#allocation3], 128  }
  0x22   :  { %668 = vsyncadd [#allocation3], 4294967168 }
  0x23   :  { %669 = dma.done.wait [#allocation5], 8320  }
  0x24   :  { %670 = vsyncadd [#allocation5], 4294958976  ;;  %v676_v0 = vmov 0.0   ;;  %vm677_vm0 = vmmov 0   ;;  %v54_v1 = vld [vmem:[#allocation4 + $0x8] sm:$0xff]  ;;  %v53_v2 = vld [vmem:[#allocation4] sm:$0xff]  ;;  %v55_v33 = vlaneseq }
  0x25   :  { %486 = vmatprep.subr.mxu0 %v676_v0  ;;  %490 = vmatprep.mubr.msk.f32.mxu0 %vm677_vm0, %v676_v0  ;;  %v52_v3 = vld [vmem:[#allocation2] sm:$0xff]  ;;  %vm59_vm1 = vcmask 130048   ;;  %v150_v5 = vld [vmem:[#allocation4 + $0xf0] sm:$0xff]  ;;  %v149_v6 = vld [vmem:[#allocation4 + $0xe8] sm:$0xff]  ;;  %vm423_vm5 = vcmask 31744  }
  0x26   :  { %493 = vmatprep.subr.mxu1 %v676_v0  ;;  %525 = vmatprep.mubr.msk.f32.mxu1 %vm677_vm0, %v676_v0  ;;  %v151_v4 = vld [vmem:[#allocation4 + $0xf8] sm:$0xff]  ;;  %v148_v7 = vld [vmem:[#allocation4 + $0xe0] sm:$0xff]  ;;  %v146_v9 = vld [vmem:[#allocation4 + $0xd0] sm:$0xff]  ;;  %v747_v34 = vshrl.u32 %v55_v33, 7 }
  0x27   :  { %487 = vmatpush3.msra.mxu0 %v54_v1  ;;  %494 = vmatpush3.msra.mxu1 %v151_v4  ;;  %v147_v8 = vld [vmem:[#allocation4 + $0xd8] sm:$0xff]  ;;  %v145_v10 = vld [vmem:[#allocation4 + $0xc8] sm:$0xff]  ;;  %v144_v11 = vld [vmem:[#allocation4 + $0xc0] sm:$0xff] }
  0x28   :  { %488 = vmatprep.subr.mxu0 %v676_v0  ;;  %495 = vmatprep.subr.mxu1 %v676_v0  ;;  %v143_v12 = vld [vmem:[#allocation4 + $0xb8] sm:$0xff]  ;;  %v142_v13 = vld [vmem:[#allocation4 + $0xb0] sm:$0xff]  ;;  %v141_v14 = vld [vmem:[#allocation4 + $0xa8] sm:$0xff]  ;;  %v57_v35 = vsub.s32 0, %v747_v34  ;;  %v154_v59 = vsub.s32 1, %v747_v34 }
  0x29   :  { %489 = vmatpush3.msra.mxu0 %v53_v2  ;;  %496 = vmatpush3.msra.mxu1 %v150_v5  ;;  %v140_v15 = vld [vmem:[#allocation4 + $0xa0] sm:$0xff]  ;;  %v139_v16 = vld [vmem:[#allocation4 + $0x98] sm:$0xff]  ;;  %v138_v17 = vld [vmem:[#allocation4 + $0x90] sm:$0xff] }
  0x2a   :  { %491 = vmatmul.mubr.msk.f32.vlgmr.msra.gmra.mxu0 %vm59_vm1, %v52_v3  ;;  %497 = vmatprep.subr.mxu1 %v676_v0  ;;  %v137_v18 = vld [vmem:[#allocation4 + $0x88] sm:$0xff]  ;;  %v136_v19 = vld [vmem:[#allocation4 + $0x80] sm:$0xff]  ;;  %v244_v20 = vld [vmem:[#allocation4 + $0x178] sm:$0xff] }
  0x2b   :  { %528 = vmatprep.subr.mxu0 %v676_v0  ;;  %498 = vmatpush3.msra.mxu1 %v149_v6  ;;  %v243_v21 = vld [vmem:[#allocation4 + $0x170] sm:$0xff]  ;;  %v242_v22 = vld [vmem:[#allocation4 + $0x168] sm:$0xff]  ;;  %v241_v23 = vld [vmem:[#allocation4 + $0x160] sm:$0xff]  ;;  %v247_v6 = vsub.s32 2, %v747_v34 }
  0x2c   :  { %560 = vmatprep.mubr.msk.f32.mxu0 %vm677_vm0, %v676_v0  ;;  %499 = vmatprep.subr.mxu1 %v676_v0  ;;  %v240_v24 = vld [vmem:[#allocation4 + $0x158] sm:$0xff]  ;;  %v239_v25 = vld [vmem:[#allocation4 + $0x150] sm:$0xff]  ;;  %v238_v26 = vld [vmem:[#allocation4 + $0x148] sm:$0xff] }
  0x2d   :  { %500 = vmatpush3.msra.mxu1 %v148_v7  ;;  %529 = vmatpush3.msra.mxu0 %v244_v20  ;;  %v237_v27 = vld [vmem:[#allocation4 + $0x140] sm:$0xff]  ;;  %v236_v28 = vld [vmem:[#allocation4 + $0x138] sm:$0xff]  ;;  %v235_v29 = vld [vmem:[#allocation4 + $0x130] sm:$0xff] }
  0x2e   :  { %501 = vmatprep.subr.mxu1 %v676_v0  ;;  %530 = vmatprep.subr.mxu0 %v676_v0  ;;  %v234_v30 = vld [vmem:[#allocation4 + $0x128] sm:$0xff]  ;;  %v233_v31 = vld [vmem:[#allocation4 + $0x120] sm:$0xff]  ;;  %v232_v32 = vld [vmem:[#allocation4 + $0x118] sm:$0xff] }
  0x2f   :  { %502 = vmatpush3.msra.mxu1 %v147_v8  ;;  %531 = vmatpush3.msra.mxu0 %v243_v21  ;;  %v750_v36 = vld [vmem:[#allocation6] sm:$0xff]  ;;  %v231_v43 = vld [vmem:[#allocation4 + $0x110] sm:$0xff]  ;;  %v230_v44 = vld [vmem:[#allocation4 + $0x108] sm:$0xff] }
  0x30   :  { %503 = vmatprep.subr.mxu1 %v676_v0  ;;  %532 = vmatprep.subr.mxu0 %v676_v0  ;;  %v58_v37 = vrot.slane %v750_v36, %v57_v35  ;;  %v229_v45 = vld [vmem:[#allocation4 + $0x100] sm:$0xff]  ;;  %v337_v46 = vld [vmem:[#allocation4 + $0x1f8] sm:$0xff]  ;;  %v336_v47 = vld [vmem:[#allocation4 + $0x1f0] sm:$0xff]  ;;  %v155_v60 = vrot.slane %v750_v36, %v154_v59  ;;  %v248_v7 = vrot.slane %v750_v36, %v247_v6 }
  0x31   :  { %504 = vmatpush3.msra.mxu1 %v146_v9  ;;  %533 = vmatpush3.msra.mxu0 %v242_v22  ;;  %v335_v48 = vld [vmem:[#allocation4 + $0x1e8] sm:$0xff]  ;;  %v334_v49 = vld [vmem:[#allocation4 + $0x1e0] sm:$0xff]  ;;  %v333_v50 = vld [vmem:[#allocation4 + $0x1d8] sm:$0xff] }
  0x32   :  { %505 = vmatprep.subr.mxu1 %v676_v0  ;;  %534 = vmatprep.subr.mxu0 %v676_v0  ;;  %v332_v51 = vld [vmem:[#allocation4 + $0x1d0] sm:$0xff]  ;;  %v331_v52 = vld [vmem:[#allocation4 + $0x1c8] sm:$0xff]  ;;  %v330_v53 = vld [vmem:[#allocation4 + $0x1c0] sm:$0xff] }
  0x33   :  { %506 = vmatpush3.msra.mxu1 %v145_v10  ;;  %535 = vmatpush3.msra.mxu0 %v241_v23  ;;  %v329_v54 = vld [vmem:[#allocation4 + $0x1b8] sm:$0xff]  ;;  %v328_v55 = vld [vmem:[#allocation4 + $0x1b0] sm:$0xff]  ;;  %v327_v56 = vld [vmem:[#allocation4 + $0x1a8] sm:$0xff] }
  0x34   :  { %507 = vmatprep.subr.mxu1 %v676_v0  ;;  %536 = vmatprep.subr.mxu0 %v676_v0  ;;  %v326_v57 = vld [vmem:[#allocation4 + $0x1a0] sm:$0xff]  ;;  %v325_v58 = vld [vmem:[#allocation4 + $0x198] sm:$0xff]  ;;  %v324_v3 = vld [vmem:[#allocation4 + $0x190] sm:$0xff] }
  0x35   :  { %508 = vmatpush3.msra.mxu1 %v144_v11  ;;  %537 = vmatpush3.msra.mxu0 %v240_v24  ;;  %v323_v4 = vld [vmem:[#allocation4 + $0x188] sm:$0xff]  ;;  %v322_v5 = vld [vmem:[#allocation4 + $0x180] sm:$0xff] }
  0x36   :  { %509 = vmatprep.subr.mxu1 %v676_v0  ;;  %538 = vmatprep.subr.mxu0 %v676_v0 }
  0x37   :  { %510 = vmatpush3.msra.mxu1 %v143_v12  ;;  %539 = vmatpush3.msra.mxu0 %v239_v25 }
  0x38   :  { %511 = vmatprep.subr.mxu1 %v676_v0  ;;  %540 = vmatprep.subr.mxu0 %v676_v0 }
  0x39   :  { %512 = vmatpush3.msra.mxu1 %v142_v13  ;;  %541 = vmatpush3.msra.mxu0 %v238_v26  ;;  %v340_v13 = vsub.s32 3, %v747_v34 }
  0x3a   :  { %513 = vmatprep.subr.mxu1 %v676_v0  ;;  %542 = vmatprep.subr.mxu0 %v676_v0 }
  0x3b   :  { %514 = vmatpush3.msra.mxu1 %v141_v14  ;;  %543 = vmatpush3.msra.mxu0 %v237_v27  ;;  %v341_v14 = vrot.slane %v750_v36, %v340_v13 }
  0x3c   :  { %515 = vmatprep.subr.mxu1 %v676_v0  ;;  %544 = vmatprep.subr.mxu0 %v676_v0 }
  0x3d   :  { %516 = vmatpush3.msra.mxu1 %v140_v15  ;;  %545 = vmatpush3.msra.mxu0 %v236_v28 }
  0x3e   :  { %517 = vmatprep.subr.mxu1 %v676_v0  ;;  %546 = vmatprep.subr.mxu0 %v676_v0 }
  0x3f   :  { %518 = vmatpush3.msra.mxu1 %v139_v16  ;;  %547 = vmatpush3.msra.mxu0 %v235_v29 }
  0x40   :  { %519 = vmatprep.subr.mxu1 %v676_v0  ;;  %548 = vmatprep.subr.mxu0 %v676_v0 }
  0x41   :  { %520 = vmatpush3.msra.mxu1 %v138_v17  ;;  %549 = vmatpush3.msra.mxu0 %v234_v30 }
  0x42   :  { %521 = vmatprep.subr.mxu1 %v676_v0  ;;  %550 = vmatprep.subr.mxu0 %v676_v0 }
  0x43   :  { %522 = vmatpush3.msra.mxu1 %v137_v18  ;;  %551 = vmatpush3.msra.mxu0 %v233_v31 }
  0x44   :  { %523 = vmatprep.subr.mxu1 %v676_v0  ;;  %552 = vmatprep.subr.mxu0 %v676_v0 }
  0x45   :  { %524 = vmatpush3.msra.mxu1 %v136_v19  ;;  %553 = vmatpush3.msra.mxu0 %v232_v32 }
  0x46   :  { %563 = vmatprep.subr.mxu1 %v676_v0  ;;  %554 = vmatprep.subr.mxu0 %v676_v0 }
  0x47   :  { %555 = vmatpush3.msra.mxu0 %v231_v43 }
  0x48   :  { %556 = vmatprep.subr.mxu0 %v676_v0 }
  0x49   :  { %557 = vmatpush3.msra.mxu0 %v230_v44 }
  0x4a   :  { %558 = vmatprep.subr.mxu0 %v676_v0 }
  0x4b   :  { %559 = vmatpush3.msra.mxu0 %v229_v45 }
  0xea   :  { %v129_v38 = vpop.f32.mrf.mxu0 }
  0xeb   :  { %v130_v39 = vadd.f32 %v129_v38, %v58_v37 }
  0xec   :  { %v492_v40 = vpop.f32.mrf.mxu0 }
  0xed   :  { %v134_v41 = vmul.f32 0.01, %v130_v39  ;;  %vm133_vm2 = vcmp.gt.f32.partialorder %v130_v39, 0.0 }
  0xef   :  { %v135_v42 = vsel %vm133_vm2, %v130_v39, %v134_v41 }
  0xf0   :  { %526 = vmatmul.mubr.f32.vlgmr.msra.gmra.mxu1 %v135_v42 }
  0xf1   :  { %595 = vmatprep.mubr.msk.f32.mxu1 %vm677_vm0, %v676_v0  ;;  %564 = vmatpush3.msra.mxu1 %v337_v46 }
  0xf2   :  { %565 = vmatprep.subr.mxu1 %v676_v0 }
  0xf3   :  { %566 = vmatpush3.msra.mxu1 %v336_v47 }
  0xf4   :  { %567 = vmatprep.subr.mxu1 %v676_v0 }
  0xf5   :  { %568 = vmatpush3.msra.mxu1 %v335_v48 }
  0xf6   :  { %569 = vmatprep.subr.mxu1 %v676_v0 }
  0xf7   :  { %570 = vmatpush3.msra.mxu1 %v334_v49 }
  0xf8   :  { %571 = vmatprep.subr.mxu1 %v676_v0 }
  0xf9   :  { %572 = vmatpush3.msra.mxu1 %v333_v50 }
  0xfa   :  { %573 = vmatprep.subr.mxu1 %v676_v0 }
  0xfb   :  { %574 = vmatpush3.msra.mxu1 %v332_v51 }
  0xfc   :  { %575 = vmatprep.subr.mxu1 %v676_v0 }
  0xfd   :  { %576 = vmatpush3.msra.mxu1 %v331_v52 }
  0xfe   :  { %577 = vmatprep.subr.mxu1 %v676_v0 }
  0xff   :  { %578 = vmatpush3.msra.mxu1 %v330_v53 }
 0x100   :  { %579 = vmatprep.subr.mxu1 %v676_v0 }
 0x101   :  { %580 = vmatpush3.msra.mxu1 %v329_v54 }
 0x102   :  { %581 = vmatprep.subr.mxu1 %v676_v0 }
 0x103   :  { %582 = vmatpush3.msra.mxu1 %v328_v55 }
 0x104   :  { %583 = vmatprep.subr.mxu1 %v676_v0 }
 0x105   :  { %584 = vmatpush3.msra.mxu1 %v327_v56 }
 0x106   :  { %585 = vmatprep.subr.mxu1 %v676_v0 }
 0x107   :  { %586 = vmatpush3.msra.mxu1 %v326_v57 }
 0x108   :  { %587 = vmatprep.subr.mxu1 %v676_v0 }
 0x109   :  { %588 = vmatpush3.msra.mxu1 %v325_v58 }
 0x10a   :  { %589 = vmatprep.subr.mxu1 %v676_v0 }
 0x10b   :  { %590 = vmatpush3.msra.mxu1 %v324_v3 }
 0x10c   :  { %591 = vmatprep.subr.mxu1 %v676_v0 }
 0x10d   :  { %592 = vmatpush3.msra.mxu1 %v323_v4 }
 0x10e   :  { %593 = vmatprep.subr.mxu1 %v676_v0  ;;  %v678_v0 = vmov 4  }
 0x10f   :  { %594 = vmatpush3.msra.mxu1 %v322_v5  ;;  %606 = vset.pattern.permute.xlu0 %v678_v0 }
 0x1b0   :  { %v222_v61 = vpop.f32.mrf.mxu1 }
 0x1b1   :  { %v223_v62 = vadd.f32 %v222_v61, %v155_v60 }
 0x1b2   :  { %v527_v63 = vpop.f32.mrf.mxu1 }
 0x1b3   :  { %vm226_vm3 = vcmp.gt.f32.partialorder %v223_v62, 0.0  ;;  %v227_v1 = vmul.f32 0.01, %v223_v62 }
 0x1b5   :  { %v228_v2 = vsel %vm226_vm3, %v223_v62, %v227_v1 }
 0x1b6   :  { %561 = vmatmul.mubr.f32.vlgmr.msra.gmra.mxu0 %v228_v2 }
 0x276   :  { %v315_v8 = vpop.f32.mrf.mxu0 }
 0x277   :  { %v316_v9 = vadd.f32 %v315_v8, %v248_v7 }
 0x278   :  { %v562_v10 = vpop.f32.mrf.mxu0 }
 0x279   :  { %vm319_vm4 = vcmp.gt.f32.partialorder %v316_v9, 0.0  ;;  %v320_v11 = vmul.f32 0.01, %v316_v9 }
 0x27b   :  { %v321_v12 = vsel %vm319_vm4, %v316_v9, %v320_v11 }
 0x27c   :  { %596 = vmatmul.mubr.f32.vlgmr.msra.gmra.mxu1 %v321_v12 }
 0x33c   :  { %v408_v15 = vpop.f32.mrf.mxu1 }
 0x33d   :  { %v409_v16 = vadd.f32 %v408_v15, %v341_v14 }
 0x33e   :  { %v597_v17 = vpop.f32.mrf.mxu1 }
 0x33f   :  { %412 = vadd.xlane.f32.xlu0 %v409_v16 }
 0x3c8   :  { %v413_v18 = vpop.xlane.xlu0 %412 }
 0x3c9   :  { %v414_v19 = vsub.f32 %v413_v18, %v409_v16 }
 0x3cb   :  { %v415_v20 = vmul.f32 0.25, %v414_v19 }
 0x3cd   :  { %v416_v21 = vsub.f32 %v409_v16, %v415_v20 }
 0x3cf   :  { %419 = vperm.xlu0 %606, %v416_v21  }
 0x44a   :  { %v420_v22 = vpop.permute.xlu0 %419 }
 0x44b   :  { %v422_v23 = vadd.f32 %v420_v22, %v409_v16 }
 0x44d   :  { %424 = vst.msk [vmem:[%s784_s3] sm:$0xff] %vm423_vm5, %v422_v23 }
 0x44e   :  { %429 = vsyncpa [#allocation3], 1 }
 0x44f   :  { %430 = vsyncpa [#allocation5], 1 }

</bundles_post_ra>
